<compile_context>
chip_gen: v7x
topology: tpu7x:2x2x1
jax: 0.10.0
libtpu: 0.0.40
codegen_flags: <defaults>
</compile_context>

<pallas_src>
import jax
import jax.numpy as jnp
from jax.experimental import pallas as pl
from jax.experimental.pallas import tpu as pltpu

EPS = 1e-5


def _interp_matrix(n_out: int, n_in: int) -> jnp.ndarray:
    """Row-stochastic 1-D linear interpolation matrix, align_corners=True."""
    if n_out == 1:
        s = jnp.zeros((1,), jnp.float32)
    else:
        s = jnp.arange(n_out, dtype=jnp.float32) * (n_in - 1) / (n_out - 1)
    i0 = jnp.clip(jnp.floor(s).astype(jnp.int32), 0, max(n_in - 1, 0))
    i1 = jnp.clip(i0 + 1, 0, n_in - 1)
    frac = s - i0.astype(jnp.float32)
    R = (jax.nn.one_hot(i0, n_in, dtype=jnp.float32) * (1.0 - frac)[:, None]
         + jax.nn.one_hot(i1, n_in, dtype=jnp.float32) * frac[:, None])
    return R  # (n_out, n_in)


def _norm_squash_resize_kernel(x_ref, w_ref, b_ref, p_ref, e_ref, rt_ref,
                               o_ref, xn_ref):
    # x_ref : (M, HW)   lane-dense input block, M = bb*C rows
    # w_ref : (M, 1)    per-row LayerNorm weight (channel pattern tiled over batch)
    # b_ref : (M, 1)    per-row LayerNorm bias
    # p_ref : (bb, M)   block-diagonal 1/C entries: channel-mean reduction operator
    # e_ref : (M, bb)   block-diagonal 1.0 entries: broadcast-back operator
    # rt_ref: (HW, TN)  pre-transposed fused interpolation operator tile
    # o_ref : (M, TN)   lane-dense output block
    # xn_ref: (M, HW)   f32 scratch: normalized+tanh'd rows, cached across TN tiles

    @pl.when(pl.program_id(1) == 0)
    def _():
        x = x_ref[...].astype(jnp.float32)                            # (M, HW)
        p = p_ref[...]                                                # (bb, M)
        # ChannelNorm (LayerNorm over C, per pixel): single-pass stats via MXU.
        mean = jnp.dot(p, x, preferred_element_type=jnp.float32)      # (bb, HW)
        m2 = jnp.dot(p, x * x, preferred_element_type=jnp.float32)    # (bb, HW)
        var = jnp.maximum(m2 - mean * mean, 0.0)
        inv = jax.lax.rsqrt(var + EPS)                                # (bb, HW)
        e = e_ref[...]                                                # (M, bb)
        inv_b = jnp.dot(e, inv, preferred_element_type=jnp.float32)           # (M, HW)
        shift_b = jnp.dot(e, mean * inv, preferred_element_type=jnp.float32)  # (M, HW)
        xn = (x * inv_b - shift_b) * w_ref[...] + b_ref[...]
        xn_ref[...] = jnp.tanh(xn)                                    # FeedbackScale('tanh')

    # Fused bilinear resize (align_corners=True): one (M, HW) @ (HW, TN) matmul,
    # RHS already transposed, result stored lane-dense (unmasked vst).
    y = jnp.dot(xn_ref[...], rt_ref[...], preferred_element_type=jnp.float32)
    o_ref[...] = y.astype(o_ref.dtype)


def _pick_batch_block(B: int, C: int, cap: int) -> int:
    """Largest divisor bb of B with bb <= cap and bb*C a multiple of 8."""
    for d in range(min(B, cap), 0, -1):
        if B % d == 0 and (d * C) % 8 == 0:
            return d
    return B  # full-extent block is always a legal BlockSpec


def _pick_lane_tile(n: int, cap: int) -> int:
    """Largest multiple of 128 <= cap that divides n; else the full extent."""
    if n <= cap:
        return n
    best = None
    t = 128
    while t <= cap:
        if n % t == 0:
            best = t
        t += 128
    return best if best is not None else n


def norm_squash_resize(x, weight, bias, out_size, *,
                       batch_block=8, lane_tile_cap=2048):
    """x: (B, C, H, W). weight/bias: (C,). out_size: (Hout, Wout)."""
    B, C, H, W = x.shape
    Hout, Wout = out_size
    HW, HWO = H * W, Hout * Wout

    bb = _pick_batch_block(B, C, batch_block)          # images packed per block
    tn = _pick_lane_tile(HWO, lane_tile_cap)           # output lane tile
    M = bb * C                                         # rows per block
    grid = (B // bb, HWO // tn)

    # Fused, pre-transposed interpolation operator: (H*W, Hout*Wout).
    rh = _interp_matrix(Hout, H)                       # (Hout, H)
    rw = _interp_matrix(Wout, W)                       # (Wout, W)
    rt = jnp.kron(rh, rw).T                            # (H*W, Hout*Wout)

    # Per-row affine params (channel pattern repeated over the batch rows).
    w_rows = jnp.tile(weight.astype(jnp.float32), B).reshape(B * C, 1)
    b_rows = jnp.tile(bias.astype(jnp.float32), B).reshape(B * C, 1)

    # Block-diagonal reduce / broadcast operators for the channel statistics.
    gidx = jnp.arange(M, dtype=jnp.int32) // C         # group (image) per row
    e_mat = jax.nn.one_hot(gidx, bb, dtype=jnp.float32)          # (M, bb)
    p_mat = e_mat.T * jnp.float32(1.0 / C)                       # (bb, M)

    # Free reshape of contiguous NCHW -> lane-dense (B*C, H*W).
    x_flat = x.reshape(B * C, HW)

    # Explicit VMEM budget: double-buffered blocks + scratch + f32 working set.
    itemsize = jnp.dtype(x.dtype).itemsize
    est = (2 * M * HW * itemsize          # input blocks
           + 2 * M * tn * itemsize        # output blocks
           + 2 * HW * tn * 4              # interpolation operator tiles
           + M * HW * 4                   # xn scratch
           + 4 * M * max(HW, tn) * 4      # f32 working values
           + (2 << 20))
    vmem_limit = int(min(max(est, 16 << 20), 64 << 20))

    # TODO(synk): for very large H*W (v7x 64 MiB VMEM), add a K-tile
    # ("arbitrary") grid axis with a VMEM accumulator / separable resize so the
    # whole (M, H*W) input and (H*W, TN) operator don't have to be resident.

    grid_spec = pltpu.PrefetchScalarGridSpec(
        num_scalar_prefetch=0,
        grid=grid,
        in_specs=[
            pl.BlockSpec((M, HW), lambda i, j: (i, 0)),
            pl.BlockSpec((M, 1), lambda i, j: (i, 0)),
            pl.BlockSpec((M, 1), lambda i, j: (i, 0)),
            pl.BlockSpec((bb, M), lambda i, j: (0, 0)),
            pl.BlockSpec((M, bb), lambda i, j: (0, 0)),
            pl.BlockSpec((HW, tn), lambda i, j: (0, j)),
        ],
        out_specs=pl.BlockSpec((M, tn), lambda i, j: (i, j)),
        scratch_shapes=[pltpu.VMEM((M, HW), jnp.float32)],
    )

    out_flat = pl.pallas_call(
        _norm_squash_resize_kernel,
        out_shape=jax.ShapeDtypeStruct((B * C, HWO), x.dtype),
        grid_spec=grid_spec,
        compiler_params=pltpu.CompilerParams(
            # j must stay "arbitrary": the xn scratch is reused across it.
            dimension_semantics=("parallel", "arbitrary"),
            vmem_limit_bytes=vmem_limit),
    )(x_flat, w_rows, b_rows, p_mat, e_mat, rt)

    return out_flat.reshape(B, C, Hout, Wout)


def _reference(x, weight, bias, out_size):
    # Pure-JAX reference mirroring the PyTorch forward (separable resize).
    xn = x.transpose(0, 2, 3, 1)                                  # NHWC
    mean = jnp.mean(xn, axis=-1, keepdims=True)
    var = jnp.mean((xn - mean) ** 2, axis=-1, keepdims=True)
    xn = (xn - mean) / jnp.sqrt(var + EPS) * weight + bias
    xn = jnp.tanh(xn).transpose(0, 3, 1, 2)                       # back to NCHW
    B, C, H, W = xn.shape
    rh = _interp_matrix(out_size[0], H)
    rw = _interp_matrix(out_size[1], W)
    y = jnp.einsum('bchw,pw->bchp', xn, rw)
    y = jnp.einsum('bchp,oh->bcop', y, rh)
    return y


if __name__ == "__main__":
    key = jax.random.PRNGKey(0)
    B, C, H, W = 2, 4, 16, 16
    out_size = (32, 32)

    kx, kw, kb = jax.random.split(key, 3)
    x = jax.random.normal(kx, (B, C, H, W), dtype=jnp.float32)
    # PyTorch LayerNorm default init is ones/zeros; perturb so the affine path
    # is actually exercised.
    weight = jnp.ones((C,), jnp.float32) + 0.1 * jax.random.normal(kw, (C,), jnp.float32)
    bias = 0.1 * jax.random.normal(kb, (C,), jnp.float32)

    out = norm_squash_resize(x, weight, bias, out_size)
    out = jax.block_until_ready(out)

    ref = _reference(x, weight, bias, out_size)
    assert out.shape == (B, C, out_size[0], out_size[1])
    assert jnp.allclose(out, ref, atol=1e-4, rtol=1e-4)

    print("KERNEL_OK")
</pallas_src>

<mosaic_0001>
module attributes {stable_mosaic.version = 11 : i64} {
  func.func @_norm_squash_resize_kernel(%arg0: i32, %arg1: i32, %arg2: memref<8x256xf32, #tpu.memory_space<vmem>>, %arg3: memref<8x1xf32, #tpu.memory_space<vmem>>, %arg4: memref<8x1xf32, #tpu.memory_space<vmem>>, %arg5: memref<2x8xf32, #tpu.memory_space<vmem>>, %arg6: memref<8x2xf32, #tpu.memory_space<vmem>>, %arg7: memref<256x1024xf32, #tpu.memory_space<vmem>>, %arg8: memref<8x1024xf32, #tpu.memory_space<vmem>>, %arg9: memref<8x256xf32, #tpu.memory_space<vmem>>) attributes {dimension_semantics = [#tpu.dimension_semantics<parallel>, #tpu.dimension_semantics<arbitrary>], iteration_bounds = array<i64: 1, 1>, scalar_prefetch = 0 : i64, scratch_operands = 1 : i64, tpu.core_type = #tpu.core_type<tc>, window_params = [{transform_indices = @transform_0, window_bounds = array<i64: 8, 256>}, {transform_indices = @transform_1, window_bounds = array<i64: 8, 1>}, {transform_indices = @transform_2, window_bounds = array<i64: 8, 1>}, {pipeline_mode = #tpu.pipeline_mode<synchronous>, transform_indices = @transform_3, window_bounds = array<i64: 2, 8>}, {pipeline_mode = #tpu.pipeline_mode<synchronous>, transform_indices = @transform_4, window_bounds = array<i64: 8, 2>}, {transform_indices = @transform_5, window_bounds = array<i64: 256, 1024>}, {transform_indices = @transform_6, window_bounds = array<i64: 8, 1024>}]} {
    %c0_i32 = arith.constant 0 : i32
    %0 = arith.cmpi eq, %arg1, %c0_i32 : i32
    %1 = arith.extui %0 : i1 to i32
    %c0_i32_0 = arith.constant 0 : i32
    %2 = arith.cmpi ne, %1, %c0_i32_0 : i32
    scf.if %2 {
      %c0_6 = arith.constant 0 : index
      %c0_7 = arith.constant 0 : index
      %7 = vector.load %arg2[%c0_6, %c0_7] : memref<8x256xf32, #tpu.memory_space<vmem>>, vector<8x256xf32>
      %c0_8 = arith.constant 0 : index
      %c0_9 = arith.constant 0 : index
      %8 = vector.load %arg5[%c0_8, %c0_9] : memref<2x8xf32, #tpu.memory_space<vmem>>, vector<2x8xf32>
      %cst_10 = arith.constant dense<0.000000e+00> : vector<2x256xf32>
      %9 = tpu.matmul %8, %7, %cst_10 {dimension_numbers = #tpu.dot_dimension_numbers<[1], [0], [0], [1], [0, 0, 1, 1], [], []>} : vector<2x8xf32>, vector<8x256xf32>, vector<2x256xf32> -> vector<2x256xf32>
      %10 = arith.mulf %7, %7 : vector<8x256xf32>
      %cst_11 = arith.constant dense<0.000000e+00> : vector<2x256xf32>
      %11 = tpu.matmul %8, %10, %cst_11 {dimension_numbers = #tpu.dot_dimension_numbers<[1], [0], [0], [1], [0, 0, 1, 1], [], []>} : vector<2x8xf32>, vector<8x256xf32>, vector<2x256xf32> -> vector<2x256xf32>
      %12 = arith.mulf %9, %9 : vector<2x256xf32>
      %13 = arith.subf %11, %12 : vector<2x256xf32>
      %cst_12 = arith.constant 0.000000e+00 : f32
      %14 = vector.broadcast %cst_12 : f32 to vector<2x256xf32>
      %15 = arith.maximumf %13, %14 : vector<2x256xf32>
      %cst_13 = arith.constant 9.99999974E-6 : f32
      %16 = vector.broadcast %cst_13 : f32 to vector<2x256xf32>
      %17 = arith.addf %15, %16 : vector<2x256xf32>
      %18 = math.rsqrt %17 : vector<2x256xf32>
      %c0_14 = arith.constant 0 : index
      %c0_15 = arith.constant 0 : index
      %19 = vector.load %arg6[%c0_14, %c0_15] : memref<8x2xf32, #tpu.memory_space<vmem>>, vector<8x2xf32>
      %cst_16 = arith.constant dense<0.000000e+00> : vector<8x256xf32>
      %20 = tpu.matmul %19, %18, %cst_16 {dimension_numbers = #tpu.dot_dimension_numbers<[1], [0], [0], [1], [0, 0, 1, 1], [], []>} : vector<8x2xf32>, vector<2x256xf32>, vector<8x256xf32> -> vector<8x256xf32>
      %21 = arith.mulf %9, %18 : vector<2x256xf32>
      %cst_17 = arith.constant dense<0.000000e+00> : vector<8x256xf32>
      %22 = tpu.matmul %19, %21, %cst_17 {dimension_numbers = #tpu.dot_dimension_numbers<[1], [0], [0], [1], [0, 0, 1, 1], [], []>} : vector<8x2xf32>, vector<2x256xf32>, vector<8x256xf32> -> vector<8x256xf32>
      %23 = arith.mulf %7, %20 : vector<8x256xf32>
      %24 = arith.subf %23, %22 : vector<8x256xf32>
      %c0_18 = arith.constant 0 : index
      %c0_19 = arith.constant 0 : index
      %25 = vector.load %arg3[%c0_18, %c0_19] : memref<8x1xf32, #tpu.memory_space<vmem>>, vector<8x1xf32>
      %26 = vector.broadcast %25 : vector<8x1xf32> to vector<8x256xf32>
      %27 = arith.mulf %24, %26 : vector<8x256xf32>
      %c0_20 = arith.constant 0 : index
      %c0_21 = arith.constant 0 : index
      %28 = vector.load %arg4[%c0_20, %c0_21] : memref<8x1xf32, #tpu.memory_space<vmem>>, vector<8x1xf32>
      %29 = vector.broadcast %28 : vector<8x1xf32> to vector<8x256xf32>
      %30 = arith.addf %27, %29 : vector<8x256xf32>
      %31 = math.tanh %30 : vector<8x256xf32>
      %c0_22 = arith.constant 0 : index
      %c0_23 = arith.constant 0 : index
      %32 = vector.load %arg9[%c0_22, %c0_23] : memref<8x256xf32, #tpu.memory_space<vmem>>, vector<8x256xf32>
      tpu.vector_store %arg9[%c0_22, %c0_23], %31 {strides = array<i32>} : memref<8x256xf32, #tpu.memory_space<vmem>>, vector<8x256xf32>,
    } else {
    }
    %c0 = arith.constant 0 : index
    %c0_1 = arith.constant 0 : index
    %3 = vector.load %arg9[%c0, %c0_1] : memref<8x256xf32, #tpu.memory_space<vmem>>, vector<8x256xf32>
    %c0_2 = arith.constant 0 : index
    %c0_3 = arith.constant 0 : index
    %4 = vector.load %arg7[%c0_2, %c0_3] : memref<256x1024xf32, #tpu.memory_space<vmem>>, vector<256x1024xf32>
    %cst = arith.constant dense<0.000000e+00> : vector<8x1024xf32>
    %5 = tpu.matmul %3, %4, %cst {dimension_numbers = #tpu.dot_dimension_numbers<[1], [0], [0], [1], [0, 0, 1, 1], [], []>} : vector<8x256xf32>, vector<256x1024xf32>, vector<8x1024xf32> -> vector<8x1024xf32>
    %c0_4 = arith.constant 0 : index
    %c0_5 = arith.constant 0 : index
    %6 = vector.load %arg8[%c0_4, %c0_5] : memref<8x1024xf32, #tpu.memory_space<vmem>>, vector<8x1024xf32>
    tpu.vector_store %arg8[%c0_4, %c0_5], %5 {strides = array<i32>} : memref<8x1024xf32, #tpu.memory_space<vmem>>, vector<8x1024xf32>,
    return
  }
  func.func @transform_0(%arg0: i32, %arg1: i32) -> (i32, i32) {
    %c0_i32 = arith.constant 0 : i32
    %c0_i32_0 = arith.constant 0 : i32
    return %arg0, %c0_i32 : i32, i32
  }
  func.func @transform_1(%arg0: i32, %arg1: i32) -> (i32, i32) {
    %c0_i32 = arith.constant 0 : i32
    %c0_i32_0 = arith.constant 0 : i32
    return %arg0, %c0_i32 : i32, i32
  }
  func.func @transform_2(%arg0: i32, %arg1: i32) -> (i32, i32) {
    %c0_i32 = arith.constant 0 : i32
    %c0_i32_0 = arith.constant 0 : i32
    return %arg0, %c0_i32 : i32, i32
  }
  func.func @transform_3(%arg0: i32, %arg1: i32) -> (i32, i32) {
    %c0_i32 = arith.constant 0 : i32
    %c0_i32_0 = arith.constant 0 : i32
    %c0_i32_1 = arith.constant 0 : i32
    return %c0_i32, %c0_i32_0 : i32, i32
  }
  func.func @transform_4(%arg0: i32, %arg1: i32) -> (i32, i32) {
    %c0_i32 = arith.constant 0 : i32
    %c0_i32_0 = arith.constant 0 : i32
    %c0_i32_1 = arith.constant 0 : i32
    return %c0_i32, %c0_i32_0 : i32, i32
  }
  func.func @transform_5(%arg0: i32, %arg1: i32) -> (i32, i32) {
    %c0_i32 = arith.constant 0 : i32
    %c0_i32_0 = arith.constant 0 : i32
    return %c0_i32, %arg1 : i32, i32
  }
  func.func @transform_6(%arg0: i32, %arg1: i32) -> (i32, i32) {
    %c0_i32 = arith.constant 0 : i32
    return %arg0, %arg1 : i32, i32
  }
}

</mosaic_0001>

<bundles_post_ra>
// kernel: tpu_custom_call.1
= control target key start
LH: loop header
LB: loop body
LE: loop exit
PB: predicated region body
PF: predicated region fallthrough
CT: control target
= control target key end

     0   :  { %11 = vsyncpa [#allocation4], 0  ;;  %s1388_s0 = inlined_call_operand.vmem [shape: f32[8,256], index: 0, kind: input, shape index: {}]   ;;  %s1389_s1 = inlined_call_operand.vmem [shape: f32[8,1], index: 1, kind: input, shape index: {}]   ;;  %s1390_s2 = inlined_call_operand.vmem [shape: f32[8,1], index: 2, kind: input, shape index: {}]   ;;  %s1391_s3 = inlined_call_operand.vmem [shape: f32[2,8], index: 3, kind: input, shape index: {}]   ;;  %s1392_s4 = inlined_call_operand.vmem [shape: f32[8,2], index: 4, kind: input, shape index: {}]   ;;  %s1393_s5 = inlined_call_operand.hbm [shape: f32[256,1024], index: 5, kind: input, shape index: {}]   ;;  %s1394_s6 = inlined_call_operand.hbm [shape: f32[8,1024], index: 6, kind: output, shape index: {}]  }
   0x1   :  { %12 = vsyncpa [#allocation5], 0  ;;  %s1281_s21 = smov [#allocation3]   ;;  %s1233_s25 = scalar_lea.hbm %s1393_s5, 32768 }
   0x2   :  { %s28_s22 = sshll.u32 %s1281_s21, 4  ;;  %p1234_p0 = scmp.ne.s32.totalorder %s1393_s5, %s1233_s25  ;;  %s29_s22 = int_to_ptr.vmem [resolvable:$true] %s28_s22 }
   0x3   :  { %p1237_p1 = scmp.lt.u32.totalorder %s1233_s25, %s1393_s5 }
   0x5   :  { %p1239_p2 = pnand %p1237_p1, %p1234_p0 }
   0x7   :  { %1242 = shalt.err (!%p1239_p2)
}
   0x8   :  { %s1243_s30 = scalar_lea.vmem %s29_s22, 32768  ;;  %p1248_p4 = scmp.lt.s32.totalorder %s29_s22, %s29_s22 }
   0x9   :  { %p1244_p3 = scmp.ne.s32.totalorder %s29_s22, %s1243_s30  ;;  %p1249_p5 = scmp.lt.s32.totalorder %s1243_s30, %s1243_s30 }
   0xb   :  { %p1250_p6 = por %p1249_p5, %p1248_p4 }
   0xd   :  { %p1251_p7 = pnand %p1250_p6, %p1244_p3 }
   0xf   :  { %1254 = shalt.err (!%p1251_p7)
}
  0x10   :  { %s1282_s7 = smov 1024   ;;  %s1283_s8 = smov 64  }
  0x11   :  { %34 = dma.hbm_to_vmem [thread:$0]  %s1393_s5, 32768, %s29_s22, [#allocation4], %s1282_s7, %s1282_s7, %s1283_s8  }
  0x12   :  { %1277 = dma.done.wait [#allocation4], 32768  }
  0x13   :  { %1278 = vsyncadd [#allocation4], 4294934528  ;;  %v1284_v0 = vmov 0.0   ;;  %v1337_v1 = vld [vmem:[%s1388_s0 + $0x8] sm:$0xff]  ;;  %v1342_v2 = vld [vmem:[%s1388_s0] sm:$0xff]  ;;  %vm45_vm0 = vcmask 64512  }
  0x14   :  { %113 = vmatprep.mubr.f32.mxu0 %v1284_v0  ;;  %186 = vmatprep.mubr.f32.mxu1 %v1284_v0  ;;  %v44_v3 = vld [vmem:[%s1391_s3] sm:$0x3]  ;;  %v121_v4 = vmul.f32 %v1337_v1, %v1337_v1  ;;  %v120_v5 = vmul.f32 %v1342_v2, %v1342_v2  ;;  %v1285_v7 = vmov 0   ;;  %v392_v21 = vld [vmem:[#allocation3 + $0x8] sm:$0xff]  ;;  %v394_v23 = vld [vmem:[#allocation3 + $0x18] sm:$0xff]  ;;  %vm208_vm1 = vcmask 1041408  }
  0x15   :  { %49 = vmatprep.subr.mxu0 %v1337_v1  ;;  %v369_v6 = vld [vmem:[%s1389_s1] sm:$0xff]  ;;  %1224 = vset.pattern.permute.xlu0 %v1285_v7  ;;  %v400_v22 = vld [vmem:[#allocation3 + $0x48] sm:$0xff]  ;;  %v402_v25 = vld [vmem:[#allocation3 + $0x58] sm:$0xff]  ;;  %vm204_vm2 = vcmask 15360  }
  0x16   :  { %50 = vmatpush1.msra.mxu0 %v1342_v2  ;;  %122 = vmatprep.subr.mxu1 %v121_v4  ;;  %v377_v8 = vld [vmem:[%s1390_s2] sm:$0xff]  ;;  %v393_v29 = vld [vmem:[#allocation3 + $0x10] sm:$0xff]  ;;  %v408_v31 = vld [vmem:[#allocation3 + $0x88] sm:$0xff]  ;;  %v962_v34 = vpack.c.bf16 %v400_v22, %v392_v21  ;;  %v1026_v39 = vpack.c.bf16 %v402_v25, %v394_v23 }
  0x17   :  { %954 = vmatmul.mubr.msk.f32.vlgmr.msra.gmra.mrb[0].mxu0 %vm45_vm0, %v44_v3  ;;  %123 = vmatpush1.msra.mxu1 %v120_v5  ;;  %v203_v24 = vld [vmem:[%s1392_s4] sm:$0xff]  ;;  %v401_v30 = vld [vmem:[#allocation3 + $0x50] sm:$0xff]  ;;  %v416_v35 = vld [vmem:[#allocation3 + $0xc8] sm:$0xff]  ;;  %s1286_s4 = smov [#allocation6]  }
  0x18   :  { %279 = vmatprep.mubr.f32.mxu0 %v1284_v0  ;;  %955 = vmatmul.mubr.msk.f32.vlgmr.msra.gmra.mrb[0].mxu1 %vm45_vm0, %v44_v3  ;;  %v391_v26 = vld [vmem:[#allocation3] sm:$0xff]  ;;  %v410_v36 = vld [vmem:[#allocation3 + $0x98] sm:$0xff]  ;;  %v1028_v41 = vpack.c.bf16 %v401_v30, %v393_v29  ;;  %v966_v44 = vpack.c.bf16 %v416_v35, %v408_v31  ;;  %v409_v46 = vld [vmem:[#allocation3 + $0x90] sm:$0xff]  ;;  %s945_s18 = sshll.u32 %s1286_s4, 4  ;;  %s946_s18 = int_to_ptr.vmem [resolvable:$true] %s945_s18 }
  0x19   :  { %358 = vmatprep.mubr.f32.mxu1 %v1284_v0  ;;  %372 = vperm.xlu0 %1224, %v369_v6   ;;  %v399_v27 = vld [vmem:[#allocation3 + $0x40] sm:$0xff]  ;;  %v418_v37 = vld [vmem:[#allocation3 + $0xd8] sm:$0xff]  ;;  %v417_v47 = vld [vmem:[#allocation3 + $0xd0] sm:$0xff]  ;;  %s1255_s19 = scalar_lea.vmem %s946_s18, 1024  ;;  %p1260_p9 = scmp.lt.s32.totalorder %s946_s18, %s946_s18 }
  0x1a   :  { %v964_v40 = vpack.c.bf16 %v399_v27, %v391_v26  ;;  %v407_v42 = vld [vmem:[#allocation3 + $0x80] sm:$0xff]  ;;  %v1030_v45 = vpack.c.bf16 %v418_v37, %v410_v36  ;;  %v424_v48 = vld [vmem:[#allocation3 + $0x108] sm:$0xff]  ;;  %v426_v50 = vld [vmem:[#allocation3 + $0x118] sm:$0xff]  ;;  %v1032_v53 = vpack.c.bf16 %v417_v47, %v409_v46  ;;  %p1256_p8 = scmp.ne.s32.totalorder %s946_s18, %s1255_s19  ;;  %p1261_p10 = scmp.lt.s32.totalorder %s1255_s19, %s1255_s19 }
  0x1b   :  { %v415_v43 = vld [vmem:[#allocation3 + $0xc0] sm:$0xff]  ;;  %v432_v49 = vld [vmem:[#allocation3 + $0x148] sm:$0xff]  ;;  %v434_v51 = vld [vmem:[#allocation3 + $0x158] sm:$0xff] }
  0x1c   :  { %v968_v52 = vpack.c.bf16 %v415_v43, %v407_v42  ;;  %v423_v54 = vld [vmem:[#allocation3 + $0x100] sm:$0xff]  ;;  %v970_v56 = vpack.c.bf16 %v432_v49, %v424_v48  ;;  %v1034_v57 = vpack.c.bf16 %v434_v51, %v426_v50  ;;  %v425_v58 = vld [vmem:[#allocation3 + $0x110] sm:$0xff]  ;;  %v440_v60 = vld [vmem:[#allocation3 + $0x188] sm:$0xff]  ;;  %p1262_p11 = por %p1261_p10, %p1260_p9 }
  0x1d   :  { %380 = vperm.xlu0 %1224, %v377_v8   ;;  %v431_v55 = vld [vmem:[#allocation3 + $0x140] sm:$0xff]  ;;  %v433_v59 = vld [vmem:[#allocation3 + $0x150] sm:$0xff]  ;;  %v448_v61 = vld [vmem:[#allocation3 + $0x1c8] sm:$0xff] }
  0x1e   :  { %v442_v62 = vld [vmem:[#allocation3 + $0x198] sm:$0xff]  ;;  %v972_v0 = vpack.c.bf16 %v431_v55, %v423_v54  ;;  %v1036_v3 = vpack.c.bf16 %v433_v59, %v425_v58  ;;  %v439_v4 = vld [vmem:[#allocation3 + $0x180] sm:$0xff]  ;;  %v974_v6 = vpack.c.bf16 %v448_v61, %v440_v60  ;;  %v441_v8 = vld [vmem:[#allocation3 + $0x190] sm:$0xff]  ;;  %p1263_p12 = pnand %p1262_p11, %p1256_p8 }
  0x1f   :  { %v450_v63 = vld [vmem:[#allocation3 + $0x1d8] sm:$0xff]  ;;  %v447_v5 = vld [vmem:[#allocation3 + $0x1c0] sm:$0xff]  ;;  %v465_v21 = vld [vmem:[#allocation3 + $0x250] sm:$0xff] }
  0x20   :  { %v1038_v7 = vpack.c.bf16 %v450_v63, %v442_v62  ;;  %v472_v22 = vld [vmem:[#allocation3 + $0x288] sm:$0xff]  ;;  %v482_v25 = vld [vmem:[#allocation3 + $0x2d8] sm:$0xff]  ;;  %v479_v29 = vld [vmem:[#allocation3 + $0x2c0] sm:$0xff] }
  0x21   :  { %v480_v23 = vld [vmem:[#allocation3 + $0x2c8] sm:$0xff]  ;;  %v490_v36 = vld [vmem:[#allocation3 + $0x318] sm:$0xff] }
  0x22   :  { %v982_v30 = vpack.c.bf16 %v480_v23, %v472_v22  ;;  %v496_v35 = vld [vmem:[#allocation3 + $0x348] sm:$0xff]  ;;  %v498_v37 = vld [vmem:[#allocation3 + $0x358] sm:$0xff] }
  0x23   :  { %v1050_v43 = vpack.c.bf16 %v498_v37, %v490_v36  ;;  %v504_v46 = vld [vmem:[#allocation3 + $0x388] sm:$0xff]  ;;  %v506_v48 = vld [vmem:[#allocation3 + $0x398] sm:$0xff] }
  0x24   :  { %v512_v47 = vld [vmem:[#allocation3 + $0x3c8] sm:$0xff]  ;;  %v514_v49 = vld [vmem:[#allocation3 + $0x3d8] sm:$0xff] }
  0x25   :  { %v990_v54 = vpack.c.bf16 %v512_v47, %v504_v46  ;;  %v1054_v55 = vpack.c.bf16 %v514_v49, %v506_v48  ;;  %v520_v58 = vld [vmem:[#allocation3 + $0x408] sm:$0xff]  ;;  %v522_v60 = vld [vmem:[#allocation3 + $0x418] sm:$0xff] }
  0x26   :  { %v528_v59 = vld [vmem:[#allocation3 + $0x448] sm:$0xff]  ;;  %v530_v61 = vld [vmem:[#allocation3 + $0x458] sm:$0xff] }
  0x27   :  { %v554_v22 = vld [vmem:[#allocation3 + $0x518] sm:$0xff]  ;;  %v584_v46 = vld [vmem:[#allocation3 + $0x608] sm:$0xff] }
  0x28   :  { %v562_v23 = vld [vmem:[#allocation3 + $0x558] sm:$0xff]  ;;  %v592_v47 = vld [vmem:[#allocation3 + $0x648] sm:$0xff] }
  0x29   :  { %v570_v36 = vld [vmem:[#allocation3 + $0x598] sm:$0xff]  ;;  %v1010_v49 = vpack.c.bf16 %v592_v47, %v584_v46 }
  0x2a   :  { %v586_v48 = vld [vmem:[#allocation3 + $0x618] sm:$0xff] }
  0xea   :  { %v115_v9 = vpop.f32.mrb[0].mxu0 }
  0xeb   :  { %v193_v10 = vmul.f32 %v115_v9, %v115_v9  ;;  %v117_v11 = vpop.f32.mrb[1].mxu0  ;;  %v188_v13 = vpop.f32.mrb[0].mxu1 }
  0xec   :  { %v194_v12 = vmul.f32 %v117_v11, %v117_v11  ;;  %v190_v15 = vpop.f32.mrb[1].mxu1 }
  0xed   :  { %v195_v14 = vsub.f32 %v188_v13, %v193_v10  ;;  %v456_v10 = vld [vmem:[#allocation3 + $0x208] sm:$0xff]  ;;  %v466_v13 = vld [vmem:[#allocation3 + $0x258] sm:$0xff] }
  0xee   :  { %v196_v16 = vsub.f32 %v190_v15, %v194_v12  ;;  %v458_v12 = vld [vmem:[#allocation3 + $0x218] sm:$0xff] }
  0xef   :  { %v197_v17 = vmax.f32 %v195_v14, 0.0  ;;  %v976_v14 = vpack.c.bf16 %v447_v5, %v439_v4  ;;  %v994_v4 = vpack.c.bf16 %v528_v59, %v520_v58  ;;  %v1058_v5 = vpack.c.bf16 %v530_v61, %v522_v60  ;;  %v600_v58 = vld [vmem:[#allocation3 + $0x688] sm:$0xff]  ;;  %v602_v60 = vld [vmem:[#allocation3 + $0x698] sm:$0xff] }
  0xf0   :  { %v198_v18 = vmax.f32 %v196_v16, 0.0  ;;  %v455_v16 = vld [vmem:[#allocation3 + $0x200] sm:$0xff]  ;;  %v608_v59 = vld [vmem:[#allocation3 + $0x6c8] sm:$0xff] }
  0xf1   :  { %v199_v19 = vadd.f32 1e-05, %v197_v17  ;;  %v463_v17 = vld [vmem:[#allocation3 + $0x240] sm:$0xff]  ;;  %v1014_v61 = vpack.c.bf16 %v608_v59, %v600_v58  ;;  %v422_v58 = vld [vmem:[#allocation3 + $0xf8] sm:$0xff] }
  0xf2   :  { %v200_v20 = vadd.f32 1e-05, %v198_v18  ;;  %v980_v26 = vpack.c.bf16 %v463_v17, %v455_v16 }
  0xf3   :  { %1225 = vrsqrt.f32 %v199_v19  ;;  %v1042_v19 = vpack.c.bf16 %v466_v13, %v458_v12 }
  0xf4   :  { %1227 = vrsqrt.f32 %v200_v20  ;;  %v457_v20 = vld [vmem:[#allocation3 + $0x210] sm:$0xff] }
  0xf5   :  { %v1044_v27 = vpack.c.bf16 %v465_v21, %v457_v20  ;;  %v552_v20 = vld [vmem:[#allocation3 + $0x508] sm:$0xff] }
  0xf6   :  { %v560_v21 = vld [vmem:[#allocation3 + $0x548] sm:$0xff] }
  0xfd   :  { %v1226_v28 = vpop.eup %1225 }
  0xfe   :  { %v1228_v32 = vpop.eup %1227  ;;  %v286_v33 = vmul.f32 %v1226_v28, %v115_v9  ;;  %v449_v9 = vld [vmem:[#allocation3 + $0x1d0] sm:$0xff] }
  0xff   :  { %956 = vmatprep.subr.msk.mxu0 %vm208_vm1, %v1228_v32  ;;  %v287_v38 = vmul.f32 %v1228_v32, %v117_v11  ;;  %v464_v11 = vld [vmem:[#allocation3 + $0x248] sm:$0xff]  ;;  %v1040_v15 = vpack.c.bf16 %v449_v9, %v441_v8  ;;  %v473_v32 = vld [vmem:[#allocation3 + $0x290] sm:$0xff] }
 0x100   :  { %957 = vmatpush1.msk.msra.mxu0 %vm208_vm1, %v1226_v28  ;;  %v978_v18 = vpack.c.bf16 %v464_v11, %v456_v10  ;;  %v471_v28 = vld [vmem:[#allocation3 + $0x280] sm:$0xff]  ;;  %v536_v8 = vld [vmem:[#allocation3 + $0x488] sm:$0xff]  ;;  %v538_v10 = vld [vmem:[#allocation3 + $0x498] sm:$0xff] }
 0x101   :  { %958 = vmatmul.mubr.msk.f32.vlgmr.msra.gmra.mrb[2].mxu0 %vm204_vm2, %v203_v24  ;;  %959 = vmatprep.subr.msk.mxu1 %vm208_vm1, %v287_v38  ;;  %v984_v38 = vpack.c.bf16 %v479_v29, %v471_v28  ;;  %v544_v9 = vld [vmem:[#allocation3 + $0x4c8] sm:$0xff]  ;;  %v546_v11 = vld [vmem:[#allocation3 + $0x4d8] sm:$0xff]  ;;  %v1066_v28 = vpack.c.bf16 %v562_v23, %v554_v22  ;;  %v559_v29 = vld [vmem:[#allocation3 + $0x540] sm:$0xff] }
 0x102   :  { %960 = vmatpush1.msk.msra.mxu1 %vm208_vm1, %v286_v33  ;;  %963 = vmatprep.subr.bf16.mxu0 %v962_v34  ;;  %v481_v33 = vld [vmem:[#allocation3 + $0x2d0] sm:$0xff]  ;;  %v488_v34 = vld [vmem:[#allocation3 + $0x308] sm:$0xff]  ;;  %v998_v16 = vpack.c.bf16 %v544_v9, %v536_v8  ;;  %v1062_v17 = vpack.c.bf16 %v546_v11, %v538_v10  ;;  %v618_v10 = vld [vmem:[#allocation3 + $0x718] sm:$0xff] }
 0x103   :  { %961 = vmatmul.mubr.msk.f32.vlgmr.msra.gmra.mrb[2].mxu1 %vm204_vm2, %v203_v24  ;;  %1027 = vmatprep.subr.bf16.mxu1 %v1026_v39  ;;  %v474_v24 = vld [vmem:[#allocation3 + $0x298] sm:$0xff]  ;;  %v1048_v39 = vpack.c.bf16 %v481_v33, %v473_v32  ;;  %v986_v42 = vpack.c.bf16 %v496_v35, %v488_v34  ;;  %v568_v34 = vld [vmem:[#allocation3 + $0x588] sm:$0xff] }
 0x104   :  { %965 = vmatpush1.bf16.msra.mxu0 %v964_v40  ;;  %1029 = vmatpush1.bf16.msra.mxu1 %v1028_v41  ;;  %v1046_v31 = vpack.c.bf16 %v482_v25, %v474_v24  ;;  %v487_v40 = vld [vmem:[#allocation3 + $0x300] sm:$0xff]  ;;  %v576_v35 = vld [vmem:[#allocation3 + $0x5c8] sm:$0xff]  ;;  %v634_v22 = vld [vmem:[#allocation3 + $0x798] sm:$0xff] }
 0x105   :  { %967 = vmatprep.subr.bf16.mxu0 %v966_v44  ;;  %1031 = vmatprep.subr.bf16.mxu1 %v1030_v45  ;;  %v495_v41 = vld [vmem:[#allocation3 + $0x340] sm:$0xff]  ;;  %v489_v44 = vld [vmem:[#allocation3 + $0x310] sm:$0xff]  ;;  %v1006_v37 = vpack.c.bf16 %v576_v35, %v568_v34  ;;  %v616_v8 = vld [vmem:[#allocation3 + $0x708] sm:$0xff] }
 0x106   :  { %v497_v45 = vld [vmem:[#allocation3 + $0x350] sm:$0xff]  ;;  %v988_v50 = vpack.c.bf16 %v495_v41, %v487_v40  ;;  %v575_v40 = vld [vmem:[#allocation3 + $0x5c0] sm:$0xff]  ;;  %v624_v9 = vld [vmem:[#allocation3 + $0x748] sm:$0xff] }
 0x107   :  { %v1052_v51 = vpack.c.bf16 %v497_v45, %v489_v44  ;;  %v577_v44 = vld [vmem:[#allocation3 + $0x5d0] sm:$0xff]  ;;  %v1018_v11 = vpack.c.bf16 %v624_v9, %v616_v8  ;;  %v642_v23 = vld [vmem:[#allocation3 + $0x7d8] sm:$0xff] }
 0x108   :  { %969 = vmatpush1.bf16.msra.mxu0 %v968_v52  ;;  %1033 = vmatpush1.bf16.msra.mxu1 %v1032_v53  ;;  %v503_v52 = vld [vmem:[#allocation3 + $0x380] sm:$0xff]  ;;  %v398_v34 = vld [vmem:[#allocation3 + $0x38] sm:$0xff] }
 0x109   :  { %971 = vmatprep.subr.bf16.mxu0 %v970_v56  ;;  %1035 = vmatprep.subr.bf16.mxu1 %v1034_v57  ;;  %v511_v53 = vld [vmem:[#allocation3 + $0x3c0] sm:$0xff]  ;;  %v505_v56 = vld [vmem:[#allocation3 + $0x390] sm:$0xff]  ;;  %v430_v8 = vld [vmem:[#allocation3 + $0x138] sm:$0xff] }
 0x10a   :  { %v513_v57 = vld [vmem:[#allocation3 + $0x3d0] sm:$0xff]  ;;  %v992_v62 = vpack.c.bf16 %v511_v53, %v503_v52  ;;  %v591_v52 = vld [vmem:[#allocation3 + $0x640] sm:$0xff]  ;;  %v438_v9 = vld [vmem:[#allocation3 + $0x178] sm:$0xff] }
 0x10b   :  { %v1056_v63 = vpack.c.bf16 %v513_v57, %v505_v56  ;;  %v593_v56 = vld [vmem:[#allocation3 + $0x650] sm:$0xff] }
 0x10c   :  { %973 = vmatpush1.bf16.msra.mxu0 %v972_v0  ;;  %1037 = vmatpush1.bf16.msra.mxu1 %v1036_v3  ;;  %v519_v0 = vld [vmem:[#allocation3 + $0x400] sm:$0xff] }
 0x10d   :  { %975 = vmatprep.subr.bf16.mxu0 %v974_v6  ;;  %1039 = vmatprep.subr.bf16.mxu1 %v1038_v7  ;;  %v527_v3 = vld [vmem:[#allocation3 + $0x440] sm:$0xff]  ;;  %v521_v6 = vld [vmem:[#allocation3 + $0x410] sm:$0xff] }
 0x10e   :  { %v529_v7 = vld [vmem:[#allocation3 + $0x450] sm:$0xff]  ;;  %v996_v12 = vpack.c.bf16 %v527_v3, %v519_v0  ;;  %v607_v0 = vld [vmem:[#allocation3 + $0x6c0] sm:$0xff] }
 0x10f   :  { %v1060_v13 = vpack.c.bf16 %v529_v7, %v521_v6  ;;  %v609_v6 = vld [vmem:[#allocation3 + $0x6d0] sm:$0xff] }
 0x110   :  { %977 = vmatpush1.bf16.msra.mxu0 %v976_v14  ;;  %1041 = vmatpush1.bf16.msra.mxu1 %v1040_v15  ;;  %v535_v14 = vld [vmem:[#allocation3 + $0x480] sm:$0xff] }
 0x111   :  { %979 = vmatprep.subr.bf16.mxu0 %v978_v18  ;;  %1043 = vmatprep.subr.bf16.mxu1 %v1042_v19  ;;  %v543_v15 = vld [vmem:[#allocation3 + $0x4c0] sm:$0xff]  ;;  %v537_v18 = vld [vmem:[#allocation3 + $0x490] sm:$0xff] }
 0x112   :  { %v545_v19 = vld [vmem:[#allocation3 + $0x4d0] sm:$0xff]  ;;  %v1000_v24 = vpack.c.bf16 %v543_v15, %v535_v14  ;;  %v623_v14 = vld [vmem:[#allocation3 + $0x740] sm:$0xff] }
 0x113   :  { %v1064_v25 = vpack.c.bf16 %v545_v19, %v537_v18  ;;  %v625_v18 = vld [vmem:[#allocation3 + $0x750] sm:$0xff]  ;;  %v632_v19 = vld [vmem:[#allocation3 + $0x788] sm:$0xff] }
 0x114   :  { %981 = vmatpush1.bf16.msra.mxu0 %v980_v26  ;;  %1045 = vmatpush1.bf16.msra.mxu1 %v1044_v27  ;;  %v551_v26 = vld [vmem:[#allocation3 + $0x500] sm:$0xff]  ;;  %v1002_v27 = vpack.c.bf16 %v560_v21, %v552_v20  ;;  %v640_v21 = vld [vmem:[#allocation3 + $0x7c8] sm:$0xff] }
 0x115   :  { %983 = vmatprep.subr.bf16.mxu0 %v982_v30  ;;  %1047 = vmatprep.subr.bf16.mxu1 %v1046_v31  ;;  %v553_v30 = vld [vmem:[#allocation3 + $0x510] sm:$0xff]  ;;  %v1004_v32 = vpack.c.bf16 %v559_v29, %v551_v26  ;;  %v631_v26 = vld [vmem:[#allocation3 + $0x780] sm:$0xff] }
 0x116   :  { %v561_v31 = vld [vmem:[#allocation3 + $0x550] sm:$0xff] }
 0x117   :  { %v1068_v33 = vpack.c.bf16 %v561_v31, %v553_v30  ;;  %v641_v30 = vld [vmem:[#allocation3 + $0x7d0] sm:$0xff] }
 0x118   :  { %985 = vmatpush1.bf16.msra.mxu0 %v984_v38  ;;  %1049 = vmatpush1.bf16.msra.mxu1 %v1048_v39  ;;  %v578_v38 = vld [vmem:[#allocation3 + $0x5d8] sm:$0xff]  ;;  %v567_v39 = vld [vmem:[#allocation3 + $0x580] sm:$0xff] }
 0x119   :  { %987 = vmatprep.subr.bf16.mxu0 %v986_v42  ;;  %1051 = vmatprep.subr.bf16.mxu1 %v1050_v43  ;;  %v1070_v41 = vpack.c.bf16 %v578_v38, %v570_v36  ;;  %v1008_v42 = vpack.c.bf16 %v575_v40, %v567_v39  ;;  %v569_v43 = vld [vmem:[#allocation3 + $0x590] sm:$0xff]  ;;  %v406_v36 = vld [vmem:[#allocation3 + $0x78] sm:$0xff]  ;;  %v373_v39 = vpop.permute.xlu0 %372 }
 0x11a   :  { %v1072_v45 = vpack.c.bf16 %v577_v44, %v569_v43 }
 0x11c   :  { %989 = vmatpush1.bf16.msra.mxu0 %v988_v50  ;;  %1053 = vmatpush1.bf16.msra.mxu1 %v1052_v51  ;;  %v594_v50 = vld [vmem:[#allocation3 + $0x658] sm:$0xff]  ;;  %v583_v51 = vld [vmem:[#allocation3 + $0x600] sm:$0xff] }
 0x11d   :  { %991 = vmatprep.subr.bf16.mxu0 %v990_v54  ;;  %1055 = vmatprep.subr.bf16.mxu1 %v1054_v55  ;;  %v1074_v53 = vpack.c.bf16 %v594_v50, %v586_v48  ;;  %v1012_v54 = vpack.c.bf16 %v591_v52, %v583_v51  ;;  %v585_v55 = vld [vmem:[#allocation3 + $0x610] sm:$0xff]  ;;  %v381_v48 = vpop.permute.xlu0 %380  ;;  %v395_v52 = vld [vmem:[#allocation3 + $0x20] sm:$0xff] }
 0x11e   :  { %v1076_v57 = vpack.c.bf16 %v593_v56, %v585_v55  ;;  %v405_v55 = vld [vmem:[#allocation3 + $0x70] sm:$0xff]  ;;  %v412_v56 = vld [vmem:[#allocation3 + $0xa8] sm:$0xff] }
 0x120   :  { %993 = vmatpush1.bf16.msra.mxu0 %v992_v62  ;;  %1057 = vmatpush1.bf16.msra.mxu1 %v1056_v63  ;;  %v610_v62 = vld [vmem:[#allocation3 + $0x6d8] sm:$0xff]  ;;  %v599_v63 = vld [vmem:[#allocation3 + $0x680] sm:$0xff] }
 0x121   :  { %995 = vmatprep.subr.bf16.mxu0 %v994_v4  ;;  %1059 = vmatprep.subr.bf16.mxu1 %v1058_v5  ;;  %v1078_v3 = vpack.c.bf16 %v610_v62, %v602_v60  ;;  %v1016_v4 = vpack.c.bf16 %v607_v0, %v599_v63  ;;  %v601_v5 = vld [vmem:[#allocation3 + $0x690] sm:$0xff]  ;;  %v411_v60 = vld [vmem:[#allocation3 + $0xa0] sm:$0xff] }
 0x122   :  { %v1080_v7 = vpack.c.bf16 %v609_v6, %v601_v5  ;;  %v413_v63 = vld [vmem:[#allocation3 + $0xb0] sm:$0xff] }
 0x123   :  { %v421_v0 = vld [vmem:[#allocation3 + $0xf0] sm:$0xff] }
 0x124   :  { %997 = vmatpush1.bf16.msra.mxu0 %v996_v12  ;;  %1061 = vmatpush1.bf16.msra.mxu1 %v1060_v13  ;;  %v626_v12 = vld [vmem:[#allocation3 + $0x758] sm:$0xff]  ;;  %v615_v13 = vld [vmem:[#allocation3 + $0x700] sm:$0xff] }
 0x125   :  { %999 = vmatprep.subr.bf16.mxu0 %v998_v16  ;;  %1063 = vmatprep.subr.bf16.mxu1 %v1062_v17  ;;  %v1082_v15 = vpack.c.bf16 %v626_v12, %v618_v10  ;;  %v1020_v16 = vpack.c.bf16 %v623_v14, %v615_v13  ;;  %v617_v17 = vld [vmem:[#allocation3 + $0x710] sm:$0xff]  ;;  %v427_v12 = vld [vmem:[#allocation3 + $0x120] sm:$0xff] }
 0x126   :  { %v1084_v20 = vpack.c.bf16 %v625_v18, %v617_v17  ;;  %v435_v13 = vld [vmem:[#allocation3 + $0x160] sm:$0xff]  ;;  %v437_v17 = vld [vmem:[#allocation3 + $0x170] sm:$0xff]  ;;  %v444_v18 = vld [vmem:[#allocation3 + $0x1a8] sm:$0xff] }
 0x128   :  { %1001 = vmatpush1.bf16.msra.mxu0 %v1000_v24  ;;  %1065 = vmatpush1.bf16.msra.mxu1 %v1064_v25  ;;  %v1022_v24 = vpack.c.bf16 %v640_v21, %v632_v19  ;;  %v1086_v25 = vpack.c.bf16 %v642_v23, %v634_v22  ;;  %v452_v19 = vld [vmem:[#allocation3 + $0x1e8] sm:$0xff]  ;;  %v454_v21 = vld [vmem:[#allocation3 + $0x1f8] sm:$0xff]  ;;  %v1100_v22 = vpack.c.bf16 %v435_v13, %v427_v12  ;;  %v509_v13 = vld [vmem:[#allocation3 + $0x3b0] sm:$0xff] }
 0x129   :  { %1003 = vmatprep.subr.bf16.mxu0 %v1002_v27  ;;  %1067 = vmatprep.subr.bf16.mxu1 %v1066_v28  ;;  %v639_v27 = vld [vmem:[#allocation3 + $0x7c0] sm:$0xff]  ;;  %v633_v28 = vld [vmem:[#allocation3 + $0x790] sm:$0xff] }
 0x12a   :  { %v1024_v29 = vpack.c.bf16 %v639_v27, %v631_v26  ;;  %v1088_v31 = vpack.c.bf16 %v641_v30, %v633_v28  ;;  %v1102_v26 = vpack.c.bf16 %v452_v19, %v444_v18  ;;  %v445_v28 = vld [vmem:[#allocation3 + $0x1b0] sm:$0xff]  ;;  %v460_v30 = vld [vmem:[#allocation3 + $0x228] sm:$0xff]  ;;  %v534_v18 = vld [vmem:[#allocation3 + $0x478] sm:$0xff] }
 0x12c   :  { %1005 = vmatpush1.bf16.msra.mxu0 %v1004_v32  ;;  %1069 = vmatpush1.bf16.msra.mxu1 %v1068_v33  ;;  %v396_v32 = vld [vmem:[#allocation3 + $0x28] sm:$0xff] }
 0x12d   :  { %1007 = vmatprep.subr.bf16.mxu0 %v1006_v37  ;;  %1071 = vmatprep.subr.bf16.mxu1 %v1070_v41  ;;  %v404_v33 = vld [vmem:[#allocation3 + $0x68] sm:$0xff]  ;;  %v1154_v37 = vpack.c.bf16 %v406_v36, %v398_v34  ;;  %v459_v36 = vld [vmem:[#allocation3 + $0x220] sm:$0xff] }
 0x12e   :  { %v1090_v35 = vpack.c.bf16 %v404_v33, %v396_v32  ;;  %v462_v32 = vld [vmem:[#allocation3 + $0x238] sm:$0xff] }
 0x12f   :  { %v470_v33 = vld [vmem:[#allocation3 + $0x278] sm:$0xff] }
 0x130   :  { %1009 = vmatpush1.bf16.msra.mxu0 %v1008_v42  ;;  %1073 = vmatpush1.bf16.msra.mxu1 %v1072_v45 }
 0x131   :  { %1011 = vmatprep.subr.bf16.mxu0 %v1010_v49  ;;  %1075 = vmatprep.subr.bf16.mxu1 %v1074_v53  ;;  %v403_v53 = vld [vmem:[#allocation3 + $0x60] sm:$0xff] }
 0x134   :  { %1013 = vmatpush1.bf16.msra.mxu0 %v1012_v54  ;;  %1077 = vmatpush1.bf16.msra.mxu1 %v1076_v57  ;;  %v397_v54 = vld [vmem:[#allocation3 + $0x30] sm:$0xff]  ;;  %v414_v57 = vld [vmem:[#allocation3 + $0xb8] sm:$0xff] }
 0x135   :  { %1015 = vmatprep.subr.bf16.mxu0 %v1014_v61  ;;  %1079 = vmatprep.subr.bf16.mxu1 %v1078_v3  ;;  %v1156_v59 = vpack.c.bf16 %v405_v55, %v397_v54  ;;  %v419_v61 = vld [vmem:[#allocation3 + $0xe0] sm:$0xff]  ;;  %v428_v3 = vld [vmem:[#allocation3 + $0x128] sm:$0xff]  ;;  %v1158_v6 = vpack.c.bf16 %v422_v58, %v414_v57 }
 0x136   :  { %v1096_v10 = vpack.c.bf16 %v419_v61, %v411_v60  ;;  %v492_v54 = vld [vmem:[#allocation3 + $0x328] sm:$0xff] }
 0x137   :  { %v500_v55 = vld [vmem:[#allocation3 + $0x368] sm:$0xff] }
 0x138   :  { %1017 = vmatpush1.bf16.msra.mxu0 %v1016_v4  ;;  %1081 = vmatpush1.bf16.msra.mxu1 %v1080_v7  ;;  %v436_v7 = vld [vmem:[#allocation3 + $0x168] sm:$0xff]  ;;  %v1114_v60 = vpack.c.bf16 %v500_v55, %v492_v54  ;;  %v582_v54 = vld [vmem:[#allocation3 + $0x5f8] sm:$0xff] }
 0x139   :  { %1019 = vmatprep.subr.bf16.mxu0 %v1018_v11  ;;  %1083 = vmatprep.subr.bf16.mxu1 %v1082_v15  ;;  %v1160_v11 = vpack.c.bf16 %v421_v0, %v413_v63  ;;  %v1098_v14 = vpack.c.bf16 %v436_v7, %v428_v3  ;;  %v1162_v15 = vpack.c.bf16 %v438_v9, %v430_v8  ;;  %v501_v63 = vld [vmem:[#allocation3 + $0x370] sm:$0xff]  ;;  %v508_v0 = vld [vmem:[#allocation3 + $0x3a8] sm:$0xff]  ;;  %v507_v9 = vld [vmem:[#allocation3 + $0x3a0] sm:$0xff] }
 0x13a   :  { %v516_v3 = vld [vmem:[#allocation3 + $0x3e8] sm:$0xff] }
 0x13c   :  { %1021 = vmatpush1.bf16.msra.mxu0 %v1020_v16  ;;  %1085 = vmatpush1.bf16.msra.mxu1 %v1084_v20  ;;  %v429_v16 = vld [vmem:[#allocation3 + $0x130] sm:$0xff]  ;;  %v446_v20 = vld [vmem:[#allocation3 + $0x1b8] sm:$0xff] }
 0x13d   :  { %1023 = vmatprep.subr.bf16.mxu0 %v1022_v24  ;;  %1087 = vmatprep.subr.bf16.mxu1 %v1086_v25  ;;  %v1164_v23 = vpack.c.bf16 %v437_v17, %v429_v16  ;;  %v443_v24 = vld [vmem:[#allocation3 + $0x1a0] sm:$0xff]  ;;  %v1166_v27 = vpack.c.bf16 %v454_v21, %v446_v20  ;;  %v532_v16 = vld [vmem:[#allocation3 + $0x468] sm:$0xff]  ;;  %v526_v17 = vld [vmem:[#allocation3 + $0x438] sm:$0xff] }
 0x13e   :  { %v451_v25 = vld [vmem:[#allocation3 + $0x1e0] sm:$0xff] }
 0x13f   :  { %v1104_v34 = vpack.c.bf16 %v451_v25, %v443_v24  ;;  %v523_v21 = vld [vmem:[#allocation3 + $0x420] sm:$0xff]  ;;  %v1186_v24 = vpack.c.bf16 %v534_v18, %v526_v17  ;;  %v525_v25 = vld [vmem:[#allocation3 + $0x430] sm:$0xff] }
 0x140   :  { %1025 = vmatpush1.bf16.msra.mxu0 %v1024_v29  ;;  %1089 = vmatpush1.bf16.msra.mxu1 %v1088_v31  ;;  %v453_v29 = vld [vmem:[#allocation3 + $0x1f0] sm:$0xff]  ;;  %v468_v31 = vld [vmem:[#allocation3 + $0x268] sm:$0xff]  ;;  %v603_v18 = vld [vmem:[#allocation3 + $0x6a0] sm:$0xff] }
 0x141   :  { %1091 = vmatprep.subr.bf16.mxu0 %v1090_v35  ;;  %1155 = vmatprep.subr.bf16.mxu1 %v1154_v37  ;;  %v1168_v35 = vpack.c.bf16 %v453_v29, %v445_v28  ;;  %v467_v37 = vld [vmem:[#allocation3 + $0x260] sm:$0xff]  ;;  %v548_v28 = vld [vmem:[#allocation3 + $0x4e8] sm:$0xff]  ;;  %v542_v29 = vld [vmem:[#allocation3 + $0x4b8] sm:$0xff] }
 0x1d4   :  { %v281_v38 = vpop.f32.mrb[2].mxu0 }
 0x1d5   :  { %v365_v40 = vmul.f32 %v281_v38, %v1342_v2  ;;  %v283_v41 = vpop.f32.mrb[3].mxu0  ;;  %v420_v2 = vld [vmem:[#allocation3 + $0xe8] sm:$0xff]  ;;  %v1106_v38 = vpack.c.bf16 %v468_v31, %v460_v30  ;;  %v550_v30 = vld [vmem:[#allocation3 + $0x4f8] sm:$0xff] }
 0x1d6   :  { %v366_v42 = vmul.f32 %v283_v41, %v1337_v1  ;;  %v360_v43 = vpop.f32.mrb[2].mxu1  ;;  %v1092_v1 = vpack.c.bf16 %v403_v53, %v395_v52  ;;  %v1094_v5 = vpack.c.bf16 %v420_v2, %v412_v56  ;;  %v469_v41 = vld [vmem:[#allocation3 + $0x270] sm:$0xff]  ;;  %v494_v56 = vld [vmem:[#allocation3 + $0x338] sm:$0xff] }
 0x1d7   :  { %v367_v44 = vsub.f32 %v365_v40, %v360_v43  ;;  %v362_v45 = vpop.f32.mrb[3].mxu1  ;;  %v461_v40 = vld [vmem:[#allocation3 + $0x230] sm:$0xff]  ;;  %v484_v43 = vld [vmem:[#allocation3 + $0x2e8] sm:$0xff]  ;;  %v502_v2 = vld [vmem:[#allocation3 + $0x378] sm:$0xff] }
 0x1d8   :  { %v368_v46 = vsub.f32 %v366_v42, %v362_v45  ;;  %v476_v42 = vld [vmem:[#allocation3 + $0x2a8] sm:$0xff]  ;;  %v486_v45 = vld [vmem:[#allocation3 + $0x2f8] sm:$0xff]  ;;  %v477_v52 = vld [vmem:[#allocation3 + $0x2b0] sm:$0xff]  ;;  %v1178_v61 = vpack.c.bf16 %v502_v2, %v494_v56 }
 0x1d9   :  { %v375_v47 = vmul.f32 %v373_v39, %v367_v44  ;;  %v478_v44 = vld [vmem:[#allocation3 + $0x2b8] sm:$0xff]  ;;  %v485_v53 = vld [vmem:[#allocation3 + $0x2f0] sm:$0xff]  ;;  %v571_v2 = vld [vmem:[#allocation3 + $0x5a0] sm:$0xff] }
 0x1da   :  { %v376_v49 = vmul.f32 %v373_v39, %v368_v46  ;;  %v1170_v39 = vpack.c.bf16 %v470_v33, %v462_v32  ;;  %v1108_v46 = vpack.c.bf16 %v467_v37, %v459_v36  ;;  %v1176_v58 = vpack.c.bf16 %v485_v53, %v477_v52  ;;  %v539_v33 = vld [vmem:[#allocation3 + $0x4a0] sm:$0xff]  ;;  %v541_v37 = vld [vmem:[#allocation3 + $0x4b0] sm:$0xff]  ;;  %v580_v52 = vld [vmem:[#allocation3 + $0x5e8] sm:$0xff] }
 0x1db   :  { %v383_v50 = vadd.f32 %v381_v48, %v375_v47  ;;  %v1172_v47 = vpack.c.bf16 %v469_v41, %v461_v40  ;;  %v1190_v36 = vpack.c.bf16 %v550_v30, %v542_v29  ;;  %v564_v40 = vld [vmem:[#allocation3 + $0x568] sm:$0xff]  ;;  %v558_v41 = vld [vmem:[#allocation3 + $0x538] sm:$0xff]  ;;  %v619_v30 = vld [vmem:[#allocation3 + $0x720] sm:$0xff] }
 0x1dc   :  { %v384_v51 = vadd.f32 %v381_v48, %v376_v49  ;;  %v475_v48 = vld [vmem:[#allocation3 + $0x2a0] sm:$0xff]  ;;  %v574_v53 = vld [vmem:[#allocation3 + $0x5b8] sm:$0xff] }
 0x1dd   :  { %v483_v49 = vld [vmem:[#allocation3 + $0x2e0] sm:$0xff] }
 0x1de   :  { %1229 = vtanh.f32 %v384_v51  ;;  %v1174_v51 = vpack.c.bf16 %v486_v45, %v478_v44  ;;  %v1112_v57 = vpack.c.bf16 %v483_v49, %v475_v48  ;;  %v555_v45 = vld [vmem:[#allocation3 + $0x520] sm:$0xff]  ;;  %v557_v49 = vld [vmem:[#allocation3 + $0x530] sm:$0xff] }
 0x1df   :  { %1231 = vtanh.f32 %v383_v50  ;;  %v1110_v50 = vpack.c.bf16 %v484_v43, %v476_v42  ;;  %v566_v42 = vld [vmem:[#allocation3 + $0x578] sm:$0xff] }
 0x1e0   :  { %v1194_v48 = vpack.c.bf16 %v566_v42, %v558_v41  ;;  %v635_v42 = vld [vmem:[#allocation3 + $0x7a0] sm:$0xff] }
 0x1e8   :  { %v1230_v62 = vpop.eup %1229 }
 0x1e9   :  { %v1370_v4 = vpop.eup %1231  ;;  %711 = vmatprep.mubr.f32.mxu0 %v1230_v62  ;;  %782 = vmatprep.mubr.f32.mxu1 %v1230_v62 }
 0x1ea   :  { %712 = vmatmul.mubr.f32.vlgmr.msra.gmra.mrb[4].mxu0 %v1370_v4  ;;  %783 = vmatmul.mubr.f32.vlgmr.msra.gmra.mrb[4].mxu1 %v1370_v4 }
 0x1eb   :  { %1093 = vmatpush1.bf16.msra.mxu0 %v1092_v1  ;;  %1157 = vmatpush1.bf16.msra.mxu1 %v1156_v59  ;;  %v491_v1 = vld [vmem:[#allocation3 + $0x320] sm:$0xff] }
 0x1ec   :  { %853 = vmatprep.mubr.f32.mxu0 %v1230_v62  ;;  %924 = vmatprep.mubr.f32.mxu1 %v1230_v62  ;;  %v499_v59 = vld [vmem:[#allocation3 + $0x360] sm:$0xff]  ;;  %v493_v62 = vld [vmem:[#allocation3 + $0x330] sm:$0xff] }
 0x1ed   :  { %1095 = vmatprep.subr.bf16.mxu0 %v1094_v5  ;;  %1159 = vmatprep.subr.bf16.mxu1 %v1158_v6  ;;  %v510_v5 = vld [vmem:[#allocation3 + $0x3b8] sm:$0xff]  ;;  %v1116_v7 = vpack.c.bf16 %v499_v59, %v491_v1  ;;  %v1180_v8 = vpack.c.bf16 %v501_v63, %v493_v62  ;;  %v1198_v1 = vpack.c.bf16 %v582_v54, %v574_v53  ;;  %v573_v59 = vld [vmem:[#allocation3 + $0x5b0] sm:$0xff]  ;;  %v596_v62 = vld [vmem:[#allocation3 + $0x668] sm:$0xff] }
 0x1ee   :  { %v518_v6 = vld [vmem:[#allocation3 + $0x3f8] sm:$0xff] }
 0x1ef   :  { %1097 = vmatpush1.bf16.msra.mxu0 %v1096_v10  ;;  %1161 = vmatpush1.bf16.msra.mxu1 %v1160_v11  ;;  %v515_v10 = vld [vmem:[#allocation3 + $0x3e0] sm:$0xff]  ;;  %v1118_v11 = vpack.c.bf16 %v516_v3, %v508_v0  ;;  %v1182_v12 = vpack.c.bf16 %v518_v6, %v510_v5  ;;  %v590_v63 = vld [vmem:[#allocation3 + $0x638] sm:$0xff] }
 0x1f0   :  { %1099 = vmatprep.subr.bf16.mxu0 %v1098_v14  ;;  %1163 = vmatprep.subr.bf16.mxu1 %v1162_v15  ;;  %v517_v14 = vld [vmem:[#allocation3 + $0x3f0] sm:$0xff]  ;;  %v524_v15 = vld [vmem:[#allocation3 + $0x428] sm:$0xff]  ;;  %v1120_v19 = vpack.c.bf16 %v515_v10, %v507_v9  ;;  %v598_v0 = vld [vmem:[#allocation3 + $0x678] sm:$0xff] }
 0x1f1   :  { %v1184_v20 = vpack.c.bf16 %v517_v14, %v509_v13  ;;  %v587_v6 = vld [vmem:[#allocation3 + $0x620] sm:$0xff]  ;;  %v1202_v9 = vpack.c.bf16 %v598_v0, %v590_v63  ;;  %v589_v10 = vld [vmem:[#allocation3 + $0x630] sm:$0xff]  ;;  %v612_v13 = vld [vmem:[#allocation3 + $0x6e8] sm:$0xff] }
 0x1f2   :  { %v606_v14 = vld [vmem:[#allocation3 + $0x6b8] sm:$0xff] }
 0x1f3   :  { %1101 = vmatpush1.bf16.msra.mxu0 %v1100_v22  ;;  %1165 = vmatpush1.bf16.msra.mxu1 %v1164_v23  ;;  %v531_v22 = vld [vmem:[#allocation3 + $0x460] sm:$0xff]  ;;  %v1122_v23 = vpack.c.bf16 %v532_v16, %v524_v15  ;;  %v614_v15 = vld [vmem:[#allocation3 + $0x6f8] sm:$0xff] }
 0x1f4   :  { %1103 = vmatprep.subr.bf16.mxu0 %v1102_v26  ;;  %1167 = vmatprep.subr.bf16.mxu1 %v1166_v27  ;;  %v533_v26 = vld [vmem:[#allocation3 + $0x470] sm:$0xff]  ;;  %v540_v27 = vld [vmem:[#allocation3 + $0x4a8] sm:$0xff]  ;;  %v1124_v31 = vpack.c.bf16 %v531_v22, %v523_v21  ;;  %v1206_v21 = vpack.c.bf16 %v614_v15, %v606_v14 }
 0x1f5   :  { %v1188_v32 = vpack.c.bf16 %v533_v26, %v525_v25  ;;  %v605_v22 = vld [vmem:[#allocation3 + $0x6b0] sm:$0xff]  ;;  %v628_v25 = vld [vmem:[#allocation3 + $0x768] sm:$0xff]  ;;  %v622_v26 = vld [vmem:[#allocation3 + $0x738] sm:$0xff] }
 0x1f7   :  { %1105 = vmatpush1.bf16.msra.mxu0 %v1104_v34  ;;  %1169 = vmatpush1.bf16.msra.mxu1 %v1168_v35  ;;  %v547_v34 = vld [vmem:[#allocation3 + $0x4e0] sm:$0xff]  ;;  %v1126_v35 = vpack.c.bf16 %v548_v28, %v540_v27  ;;  %v630_v27 = vld [vmem:[#allocation3 + $0x778] sm:$0xff] }
 0x1f8   :  { %1107 = vmatprep.subr.bf16.mxu0 %v1106_v38  ;;  %1171 = vmatprep.subr.bf16.mxu1 %v1170_v39  ;;  %v549_v38 = vld [vmem:[#allocation3 + $0x4f0] sm:$0xff]  ;;  %v556_v39 = vld [vmem:[#allocation3 + $0x528] sm:$0xff]  ;;  %v1128_v43 = vpack.c.bf16 %v547_v34, %v539_v33  ;;  %v1210_v33 = vpack.c.bf16 %v630_v27, %v622_v26 }
 0x1f9   :  { %v1192_v44 = vpack.c.bf16 %v549_v38, %v541_v37  ;;  %v621_v34 = vld [vmem:[#allocation3 + $0x730] sm:$0xff]  ;;  %v644_v37 = vld [vmem:[#allocation3 + $0x7e8] sm:$0xff]  ;;  %v638_v38 = vld [vmem:[#allocation3 + $0x7b8] sm:$0xff] }
 0x1fb   :  { %1109 = vmatpush1.bf16.msra.mxu0 %v1108_v46  ;;  %1173 = vmatpush1.bf16.msra.mxu1 %v1172_v47  ;;  %v563_v46 = vld [vmem:[#allocation3 + $0x560] sm:$0xff]  ;;  %v1130_v47 = vpack.c.bf16 %v564_v40, %v556_v39  ;;  %v646_v39 = vld [vmem:[#allocation3 + $0x7f8] sm:$0xff] }
 0x1fc   :  { %1111 = vmatprep.subr.bf16.mxu0 %v1110_v50  ;;  %1175 = vmatprep.subr.bf16.mxu1 %v1174_v51  ;;  %v565_v50 = vld [vmem:[#allocation3 + $0x570] sm:$0xff]  ;;  %v572_v51 = vld [vmem:[#allocation3 + $0x5a8] sm:$0xff]  ;;  %v1132_v55 = vpack.c.bf16 %v563_v46, %v555_v45  ;;  %v643_v45 = vld [vmem:[#allocation3 + $0x7e0] sm:$0xff] }
 0x1fd   :  { %v1196_v56 = vpack.c.bf16 %v565_v50, %v557_v49  ;;  %v637_v46 = vld [vmem:[#allocation3 + $0x7b0] sm:$0xff] }
 0x1ff   :  { %1113 = vmatpush1.bf16.msra.mxu0 %v1112_v57  ;;  %1177 = vmatpush1.bf16.msra.mxu1 %v1176_v58  ;;  %v579_v57 = vld [vmem:[#allocation3 + $0x5e0] sm:$0xff]  ;;  %v1134_v58 = vpack.c.bf16 %v580_v52, %v572_v51 }
 0x200   :  { %1115 = vmatprep.subr.bf16.mxu0 %v1114_v60  ;;  %1179 = vmatprep.subr.bf16.mxu1 %v1178_v61  ;;  %v581_v60 = vld [vmem:[#allocation3 + $0x5f0] sm:$0xff]  ;;  %v588_v61 = vld [vmem:[#allocation3 + $0x628] sm:$0xff]  ;;  %v1136_v3 = vpack.c.bf16 %v579_v57, %v571_v2 }
 0x201   :  { %v1200_v5 = vpack.c.bf16 %v581_v60, %v573_v59 }
 0x203   :  { %1117 = vmatpush1.bf16.msra.mxu0 %v1116_v7  ;;  %1181 = vmatpush1.bf16.msra.mxu1 %v1180_v8  ;;  %v595_v7 = vld [vmem:[#allocation3 + $0x660] sm:$0xff]  ;;  %v1138_v8 = vpack.c.bf16 %v596_v62, %v588_v61 }
 0x204   :  { %1119 = vmatprep.subr.bf16.mxu0 %v1118_v11  ;;  %1183 = vmatprep.subr.bf16.mxu1 %v1182_v12  ;;  %v597_v11 = vld [vmem:[#allocation3 + $0x670] sm:$0xff]  ;;  %v604_v12 = vld [vmem:[#allocation3 + $0x6a8] sm:$0xff]  ;;  %v1140_v16 = vpack.c.bf16 %v595_v7, %v587_v6 }
 0x205   :  { %v1204_v17 = vpack.c.bf16 %v597_v11, %v589_v10 }
 0x207   :  { %1121 = vmatpush1.bf16.msra.mxu0 %v1120_v19  ;;  %1185 = vmatpush1.bf16.msra.mxu1 %v1184_v20  ;;  %v611_v19 = vld [vmem:[#allocation3 + $0x6e0] sm:$0xff]  ;;  %v1142_v20 = vpack.c.bf16 %v612_v13, %v604_v12 }
 0x208   :  { %1123 = vmatprep.subr.bf16.mxu0 %v1122_v23  ;;  %1187 = vmatprep.subr.bf16.mxu1 %v1186_v24  ;;  %v613_v23 = vld [vmem:[#allocation3 + $0x6f0] sm:$0xff]  ;;  %v620_v24 = vld [vmem:[#allocation3 + $0x728] sm:$0xff]  ;;  %v1144_v28 = vpack.c.bf16 %v611_v19, %v603_v18 }
 0x209   :  { %v1208_v29 = vpack.c.bf16 %v613_v23, %v605_v22 }
 0x20b   :  { %1125 = vmatpush1.bf16.msra.mxu0 %v1124_v31  ;;  %1189 = vmatpush1.bf16.msra.mxu1 %v1188_v32  ;;  %v627_v31 = vld [vmem:[#allocation3 + $0x760] sm:$0xff]  ;;  %v1146_v32 = vpack.c.bf16 %v628_v25, %v620_v24 }
 0x20c   :  { %1127 = vmatprep.subr.bf16.mxu0 %v1126_v35  ;;  %1191 = vmatprep.subr.bf16.mxu1 %v1190_v36  ;;  %v629_v35 = vld [vmem:[#allocation3 + $0x770] sm:$0xff]  ;;  %v636_v36 = vld [vmem:[#allocation3 + $0x7a8] sm:$0xff]  ;;  %v1148_v40 = vpack.c.bf16 %v627_v31, %v619_v30 }
 0x20d   :  { %v1212_v41 = vpack.c.bf16 %v629_v35, %v621_v34 }
 0x20f   :  { %1129 = vmatpush1.bf16.msra.mxu0 %v1128_v43  ;;  %1193 = vmatpush1.bf16.msra.mxu1 %v1192_v44  ;;  %v1150_v43 = vpack.c.bf16 %v644_v37, %v636_v36  ;;  %v1214_v44 = vpack.c.bf16 %v646_v39, %v638_v38 }
 0x210   :  { %1131 = vmatprep.subr.bf16.mxu0 %v1130_v47  ;;  %1195 = vmatprep.subr.bf16.mxu1 %v1194_v48  ;;  %v645_v47 = vld [vmem:[#allocation3 + $0x7f0] sm:$0xff]  ;;  %v1152_v48 = vpack.c.bf16 %v643_v45, %v635_v42 }
 0x211   :  { %v1216_v49 = vpack.c.bf16 %v645_v47, %v637_v46 }
 0x213   :  { %1133 = vmatpush1.bf16.msra.mxu0 %v1132_v55  ;;  %1197 = vmatpush1.bf16.msra.mxu1 %v1196_v56 }
 0x214   :  { %1135 = vmatprep.subr.bf16.mxu0 %v1134_v58  ;;  %1199 = vmatprep.subr.bf16.mxu1 %v1198_v1 }
 0x217   :  { %1137 = vmatpush1.bf16.msra.mxu0 %v1136_v3  ;;  %1201 = vmatpush1.bf16.msra.mxu1 %v1200_v5 }
 0x218   :  { %1139 = vmatprep.subr.bf16.mxu0 %v1138_v8  ;;  %1203 = vmatprep.subr.bf16.mxu1 %v1202_v9 }
 0x21b   :  { %1141 = vmatpush1.bf16.msra.mxu0 %v1140_v16  ;;  %1205 = vmatpush1.bf16.msra.mxu1 %v1204_v17 }
 0x21c   :  { %1143 = vmatprep.subr.bf16.mxu0 %v1142_v20  ;;  %1207 = vmatprep.subr.bf16.mxu1 %v1206_v21 }
 0x21f   :  { %1145 = vmatpush1.bf16.msra.mxu0 %v1144_v28  ;;  %1209 = vmatpush1.bf16.msra.mxu1 %v1208_v29 }
 0x220   :  { %1147 = vmatprep.subr.bf16.mxu0 %v1146_v32  ;;  %1211 = vmatprep.subr.bf16.mxu1 %v1210_v33 }
 0x223   :  { %1149 = vmatpush1.bf16.msra.mxu0 %v1148_v40  ;;  %1213 = vmatpush1.bf16.msra.mxu1 %v1212_v41 }
 0x224   :  { %1151 = vmatprep.subr.bf16.mxu0 %v1150_v43  ;;  %1215 = vmatprep.subr.bf16.mxu1 %v1214_v44 }
 0x227   :  { %1153 = vmatpush1.bf16.msra.mxu0 %v1152_v48  ;;  %1217 = vmatpush1.bf16.msra.mxu1 %v1216_v49 }
 0x22a   :  { %854 = vmatmul.mubr.f32.vlgmr.msra.gmra.mrb[6].mxu0 %v1370_v4  ;;  %925 = vmatmul.mubr.f32.vlgmr.msra.gmra.mrb[6].mxu1 %v1370_v4 }
 0x2bd   :  { %v713_v50 = vpop.f32.mrb[4].mxu0  ;;  %v784_v51 = vpop.f32.mrb[4].mxu1 }
 0x2be   :  { %931 = vst [vmem:[#allocation6] sm:$0xff] %v713_v50  ;;  %933 = vst [vmem:[#allocation6 + $0x10] sm:$0xff] %v784_v51  ;;  %v715_v52 = vpop.f32.mrb[5].mxu0  ;;  %v786_v53 = vpop.f32.mrb[5].mxu1 }
 0x2bf   :  { %932 = vst [vmem:[#allocation6 + $0x8] sm:$0xff] %v715_v52  ;;  %934 = vst [vmem:[#allocation6 + $0x18] sm:$0xff] %v786_v53 }
 0x2fd   :  { %v855_v54 = vpop.f32.mrb[6].mxu0  ;;  %v926_v55 = vpop.f32.mrb[6].mxu1 }
 0x2fe   :  { %935 = vst [vmem:[#allocation6 + $0x20] sm:$0xff] %v855_v54  ;;  %937 = vst [vmem:[#allocation6 + $0x30] sm:$0xff] %v926_v55  ;;  %v857_v56 = vpop.f32.mrb[7].mxu0  ;;  %v928_v2 = vpop.f32.mrb[7].mxu1 }
 0x2ff   :  { %936 = vst [vmem:[#allocation6 + $0x28] sm:$0xff] %v857_v56  ;;  %938 = vst [vmem:[#allocation6 + $0x38] sm:$0xff] %v928_v2 }
 0x300   :  { %1266 = shalt.err (!%p1263_p12)
}
 0x301   :  { %s1267_s22 = scalar_lea.hbm %s1394_s6, 1024 }
 0x302   :  { %p1268_p13 = scmp.ne.s32.totalorder %s1394_s6, %s1267_s22  ;;  %p1271_p0 = scmp.lt.u32.totalorder %s1267_s22, %s1394_s6 }
 0x304   :  { %p1273_p1 = pnand %p1271_p0, %p1268_p13 }
 0x306   :  { %1276 = shalt.err (!%p1273_p1)
}
 0x307   :  { %948 = dma.vmem_to_hbm [thread:$0]  %s946_s18, 1024, %s1394_s6, [#allocation5]  }
 0x308   :  { %1279 = dma.done.wait [#allocation5], 1024  }
 0x309   :  { %1280 = vsyncadd [#allocation5], 4294966272 }
 0x30a   :  { %952 = vsyncpa [#allocation4], 1 }
 0x30b   :  { %953 = vsyncpa [#allocation5], 1 }

</bundles_post_ra>
